<compile_context>
chip_gen: v5e
topology: v5e:2x2
jax: 0.10.0
libtpu: 0.0.40
codegen_flags: <defaults>
</compile_context>

<pallas_src>
import math
import functools

import jax
import jax.numpy as jnp
from jax.experimental import pallas as pl
from jax.experimental.pallas import tpu as pltpu


def _pick_tile(s: int) -> int:
    """Largest friendly tile (multiple of 8) that evenly divides s."""
    for t in (512, 256, 128, 64, 32, 16, 8):
        if s % t == 0:
            return t
    return s  # irregular/small S: one full-extent tile (equal to array dim)


def _flash_attn_kernel(q_ref, k_ref, v_ref, wqt_ref, wkt_ref, wvt_ref, o_ref,
                       qp_ref, m_ref, l_ref, acc_ref, *, scale, compute_dtype):
    ki = pl.program_id(2)
    cd = compute_dtype

    # ---- per-(batch, q-tile) init: project Q once, reset accumulators ----
    @pl.when(ki == 0)
    def _init():
        qp = jax.lax.dot_general(
            q_ref[0], wqt_ref[...],                      # (tq, D) @ (D, D)
            dimension_numbers=(((1,), (0,)), ((), ())),
            preferred_element_type=jnp.float32)
        qp_ref[...] = qp * scale                         # fold 1/sqrt(D) into Q
        m_ref[...] = jnp.full(m_ref.shape, -jnp.inf, dtype=m_ref.dtype)
        l_ref[...] = jnp.zeros(l_ref.shape, dtype=l_ref.dtype)
        acc_ref[...] = jnp.zeros(acc_ref.shape, dtype=acc_ref.dtype)

    # ---- project this K/V tile (weights pre-transposed in the wrapper) ----
    k_proj = jax.lax.dot_general(
        k_ref[0], wkt_ref[...],
        dimension_numbers=(((1,), (0,)), ((), ())),
        preferred_element_type=jnp.float32)              # (tk, D) f32
    v_proj = jax.lax.dot_general(
        v_ref[0], wvt_ref[...],
        dimension_numbers=(((1,), (0,)), ((), ())),
        preferred_element_type=jnp.float32)              # (tk, D) f32

    # ---- scores: contract last dims directly (Q @ K^T without transpose) ----
    s = jax.lax.dot_general(
        qp_ref[...].astype(cd), k_proj.astype(cd),
        dimension_numbers=(((1,), (1,)), ((), ())),
        preferred_element_type=jnp.float32)              # (tq, tk) f32

    # ---- online softmax update (all softmax math in f32) ----
    m_prev = m_ref[...]
    m_new = jnp.maximum(m_prev, jnp.max(s, axis=-1, keepdims=True))
    alpha = jnp.exp(m_prev - m_new)
    p = jnp.exp(s - m_new)
    l_ref[...] = alpha * l_ref[...] + jnp.sum(p, axis=-1, keepdims=True)
    acc_ref[...] = alpha * acc_ref[...] + jax.lax.dot_general(
        p.astype(cd), v_proj.astype(cd),
        dimension_numbers=(((1,), (0,)), ((), ())),
        preferred_element_type=jnp.float32)
    m_ref[...] = m_new

    # ---- finalize on the last kv tile ----
    @pl.when(ki == pl.num_programs(2) - 1)
    def _finalize():
        denom = l_ref[...]
        inv = pl.reciprocal(denom, approx=True)          # EUP slot (cheap)
        inv = inv * (2.0 - denom * inv)                  # 1 Newton step -> ~f32 exact
        o_ref[0] = (acc_ref[...] * inv).astype(o_ref.dtype)


def attention_block(q, k, v, w_q, w_k, w_v, *, mxu_dtype=None,
                    tq=None, tk=None):
    """Pallas implementation of AttentionBlock.forward.

    q, k, v     : (B, S, D)
    w_q/w_k/w_v : (D, D) nn.Linear weight matrices (projection is x @ W.T)
    mxu_dtype   : optional dtype for MXU inputs (e.g. jnp.bfloat16 on v6e/v7x);
                  accumulation and softmax stay in f32.
    returns     : (B, S, D) in the input dtype
    """
    B, S, D = q.shape
    out_dtype = q.dtype
    compute_dtype = jnp.dtype(mxu_dtype) if mxu_dtype is not None else jnp.dtype(q.dtype)

    # Pre-transpose the loop-invariant weights once (x @ W.T == x @ W_t):
    # removes every per-grid-step in-kernel transpose.
    w_q_t = jnp.asarray(w_q).T.astype(compute_dtype)
    w_k_t = jnp.asarray(w_k).T.astype(compute_dtype)
    w_v_t = jnp.asarray(w_v).T.astype(compute_dtype)
    qc = q.astype(compute_dtype)
    kc = k.astype(compute_dtype)
    vc = v.astype(compute_dtype)

    tq = tq if tq is not None else _pick_tile(S)
    tk = tk if tk is not None else _pick_tile(S)
    assert S % tq == 0 and S % tk == 0
    nq, nk = S // tq, S // tk

    kernel = functools.partial(_flash_attn_kernel,
                               scale=1.0 / math.sqrt(D),
                               compute_dtype=compute_dtype)

    q_spec = pl.BlockSpec((1, tq, D), lambda b, qi, ki: (b, qi, 0))
    kv_spec = pl.BlockSpec((1, tk, D), lambda b, qi, ki: (b, ki, 0))
    w_spec = pl.BlockSpec((D, D), lambda b, qi, ki: (0, 0))
    o_spec = pl.BlockSpec((1, tq, D), lambda b, qi, ki: (b, qi, 0))

    itemsize = jnp.dtype(compute_dtype).itemsize
    cost = pl.CostEstimate(
        flops=int(2 * B * (3 * S * D * D + 2 * S * S * D)),
        transcendentals=int(B * S * S),
        bytes_accessed=int(itemsize * (3 * B * S * D + 3 * D * D)
                           + jnp.dtype(out_dtype).itemsize * B * S * D),
    )

    return pl.pallas_call(
        kernel,
        out_shape=jax.ShapeDtypeStruct((B, S, D), out_dtype),
        grid_spec=pltpu.PrefetchScalarGridSpec(
            num_scalar_prefetch=0,
            grid=(B, nq, nk),
            in_specs=[q_spec, kv_spec, kv_spec, w_spec, w_spec, w_spec],
            out_specs=o_spec,
            scratch_shapes=[
                pltpu.VMEM((tq, D), jnp.float32),   # projected (scaled) Q
                pltpu.VMEM((tq, 1), jnp.float32),   # running max m
                pltpu.VMEM((tq, 1), jnp.float32),   # running denom l
                pltpu.VMEM((tq, D), jnp.float32),   # output accumulator
            ],
        ),
        compiler_params=pltpu.CompilerParams(
            dimension_semantics=("parallel", "parallel", "arbitrary"),
            vmem_limit_bytes=64 * 1024 * 1024,
        ),
        cost_estimate=cost,
    )(qc, kc, vc, w_q_t, w_k_t, w_v_t)


def attention_block_ref(q, k, v, w_q, w_k, w_v):
    """Pure-JAX reference mirroring the PyTorch forward."""
    query = q @ w_q.T
    key = k @ w_k.T
    value = v @ w_v.T
    scores = jnp.einsum("bsd,btd->bst", query, key) / math.sqrt(q.shape[-1])
    probs = jax.nn.softmax(scores, axis=-1)
    return jnp.einsum("bst,btd->bsd", probs, value)


if __name__ == "__main__":
    B, S, D = 2, 8, 32
    key = jax.random.PRNGKey(0)
    kq, kk, kv, kwq, kwk, kwv = jax.random.split(key, 6)

    q = jax.random.normal(kq, (B, S, D), dtype=jnp.float32)
    k = jax.random.normal(kk, (B, S, D), dtype=jnp.float32)
    v = jax.random.normal(kv, (B, S, D), dtype=jnp.float32)

    # Deterministic weight init (Kaiming-uniform-like bound, as nn.Linear).
    bound = 1.0 / math.sqrt(D)
    w_q = jax.random.uniform(kwq, (D, D), jnp.float32, -bound, bound)
    w_k = jax.random.uniform(kwk, (D, D), jnp.float32, -bound, bound)
    w_v = jax.random.uniform(kwv, (D, D), jnp.float32, -bound, bound)

    ref = attention_block_ref(q, k, v, w_q, w_k, w_v)

    # f32 path (default): should match the reference tightly.
    out = attention_block(q, k, v, w_q, w_k, w_v)
    out = jax.block_until_ready(out)
    assert out.shape == (B, S, D)
    assert jnp.allclose(out, ref, atol=1e-4, rtol=1e-4)

    # bf16 MXU-input path (v6e/v7x perf mode): f32 accumulation, looser check.
    out_bf16 = attention_block(q, k, v, w_q, w_k, w_v, mxu_dtype=jnp.bfloat16)
    out_bf16 = jax.block_until_ready(out_bf16)
    assert out_bf16.shape == (B, S, D)
    assert bool(jnp.max(jnp.abs(out_bf16 - ref)) < 0.1)

    print("KERNEL_OK")
</pallas_src>

<mosaic_0001>
module attributes {stable_mosaic.version = 11 : i64} {
  func.func @_flash_attn_kernel(%arg0: i32, %arg1: i32, %arg2: i32, %arg3: memref<1x8x32xf32, #tpu.memory_space<vmem>>, %arg4: memref<1x8x32xf32, #tpu.memory_space<vmem>>, %arg5: memref<1x8x32xf32, #tpu.memory_space<vmem>>, %arg6: memref<32x32xf32, #tpu.memory_space<vmem>>, %arg7: memref<32x32xf32, #tpu.memory_space<vmem>>, %arg8: memref<32x32xf32, #tpu.memory_space<vmem>>, %arg9: memref<1x8x32xf32, #tpu.memory_space<vmem>>, %arg10: memref<8x32xf32, #tpu.memory_space<vmem>>, %arg11: memref<8x1xf32, #tpu.memory_space<vmem>>, %arg12: memref<8x1xf32, #tpu.memory_space<vmem>>, %arg13: memref<8x32xf32, #tpu.memory_space<vmem>>) attributes {dimension_semantics = [#tpu.dimension_semantics<parallel>, #tpu.dimension_semantics<parallel>, #tpu.dimension_semantics<arbitrary>], iteration_bounds = array<i64: 2, 1, 1>, scalar_prefetch = 0 : i64, scratch_operands = 4 : i64, tpu.core_type = #tpu.core_type<tc>, window_params = [{transform_indices = @transform_0, window_bounds = array<i64: 1, 8, 32>}, {transform_indices = @transform_1, window_bounds = array<i64: 1, 8, 32>}, {transform_indices = @transform_2, window_bounds = array<i64: 1, 8, 32>}, {pipeline_mode = #tpu.pipeline_mode<synchronous>, transform_indices = @transform_3, window_bounds = array<i64: 32, 32>}, {pipeline_mode = #tpu.pipeline_mode<synchronous>, transform_indices = @transform_4, window_bounds = array<i64: 32, 32>}, {pipeline_mode = #tpu.pipeline_mode<synchronous>, transform_indices = @transform_5, window_bounds = array<i64: 32, 32>}, {transform_indices = @transform_6, window_bounds = array<i64: 1, 8, 32>}]} {
    %c0_i32 = arith.constant 0 : i32
    %0 = arith.cmpi eq, %arg2, %c0_i32 : i32
    %1 = arith.extui %0 : i1 to i32
    %c0_i32_0 = arith.constant 0 : i32
    %2 = arith.cmpi ne, %1, %c0_i32_0 : i32
    scf.if %2 {
      %c0_31 = arith.constant 0 : index
      %c0_32 = arith.constant 0 : index
      %c0_33 = arith.constant 0 : index
      %38 = vector.load %arg3[%c0_31, %c0_32, %c0_33] : memref<1x8x32xf32, #tpu.memory_space<vmem>>, vector<1x8x32xf32>
      %39 = vector.shape_cast %38 : vector<1x8x32xf32> to vector<8x32xf32>
      %c0_34 = arith.constant 0 : index
      %c0_35 = arith.constant 0 : index
      %40 = vector.load %arg6[%c0_34, %c0_35] : memref<32x32xf32, #tpu.memory_space<vmem>>, vector<32x32xf32>
      %cst_36 = arith.constant dense<0.000000e+00> : vector<8x32xf32>
      %41 = tpu.matmul %39, %40, %cst_36 {dimension_numbers = #tpu.dot_dimension_numbers<[1], [0], [0], [1], [0, 0, 1, 1], [], []>} : vector<8x32xf32>, vector<32x32xf32>, vector<8x32xf32> -> vector<8x32xf32>
      %cst_37 = arith.constant 0.176776692 : f32
      %42 = vector.broadcast %cst_37 : f32 to vector<8x32xf32>
      %43 = arith.mulf %41, %42 : vector<8x32xf32>
      %c0_38 = arith.constant 0 : index
      %c0_39 = arith.constant 0 : index
      %44 = vector.load %arg10[%c0_38, %c0_39] : memref<8x32xf32, #tpu.memory_space<vmem>>, vector<8x32xf32>
      tpu.vector_store %arg10[%c0_38, %c0_39], %43 {strides = array<i32>} : memref<8x32xf32, #tpu.memory_space<vmem>>, vector<8x32xf32>,
      %cst_40 = arith.constant 0xFF800000 : f32
      %45 = vector.broadcast %cst_40 : f32 to vector<8x1xf32>
      %c0_41 = arith.constant 0 : index
      %c0_42 = arith.constant 0 : index
      %46 = vector.load %arg11[%c0_41, %c0_42] : memref<8x1xf32, #tpu.memory_space<vmem>>, vector<8x1xf32>
      tpu.vector_store %arg11[%c0_41, %c0_42], %45 {strides = array<i32>} : memref<8x1xf32, #tpu.memory_space<vmem>>, vector<8x1xf32>,
      %cst_43 = arith.constant 0.000000e+00 : f32
      %47 = vector.broadcast %cst_43 : f32 to vector<8x1xf32>
      %c0_44 = arith.constant 0 : index
      %c0_45 = arith.constant 0 : index
      %48 = vector.load %arg12[%c0_44, %c0_45] : memref<8x1xf32, #tpu.memory_space<vmem>>, vector<8x1xf32>
      tpu.vector_store %arg12[%c0_44, %c0_45], %47 {strides = array<i32>} : memref<8x1xf32, #tpu.memory_space<vmem>>, vector<8x1xf32>,
      %cst_46 = arith.constant 0.000000e+00 : f32
      %49 = vector.broadcast %cst_46 : f32 to vector<8x32xf32>
      %c0_47 = arith.constant 0 : index
      %c0_48 = arith.constant 0 : index
      %50 = vector.load %arg13[%c0_47, %c0_48] : memref<8x32xf32, #tpu.memory_space<vmem>>, vector<8x32xf32>
      tpu.vector_store %arg13[%c0_47, %c0_48], %49 {strides = array<i32>} : memref<8x32xf32, #tpu.memory_space<vmem>>, vector<8x32xf32>,
    } else {
    }
    %c0 = arith.constant 0 : index
    %c0_1 = arith.constant 0 : index
    %c0_2 = arith.constant 0 : index
    %3 = vector.load %arg4[%c0, %c0_1, %c0_2] : memref<1x8x32xf32, #tpu.memory_space<vmem>>, vector<1x8x32xf32>
    %4 = vector.shape_cast %3 : vector<1x8x32xf32> to vector<8x32xf32>
    %c0_3 = arith.constant 0 : index
    %c0_4 = arith.constant 0 : index
    %5 = vector.load %arg7[%c0_3, %c0_4] : memref<32x32xf32, #tpu.memory_space<vmem>>, vector<32x32xf32>
    %cst = arith.constant dense<0.000000e+00> : vector<8x32xf32>
    %6 = tpu.matmul %4, %5, %cst {dimension_numbers = #tpu.dot_dimension_numbers<[1], [0], [0], [1], [0, 0, 1, 1], [], []>} : vector<8x32xf32>, vector<32x32xf32>, vector<8x32xf32> -> vector<8x32xf32>
    %c0_5 = arith.constant 0 : index
    %c0_6 = arith.constant 0 : index
    %c0_7 = arith.constant 0 : index
    %7 = vector.load %arg5[%c0_5, %c0_6, %c0_7] : memref<1x8x32xf32, #tpu.memory_space<vmem>>, vector<1x8x32xf32>
    %8 = vector.shape_cast %7 : vector<1x8x32xf32> to vector<8x32xf32>
    %c0_8 = arith.constant 0 : index
    %c0_9 = arith.constant 0 : index
    %9 = vector.load %arg8[%c0_8, %c0_9] : memref<32x32xf32, #tpu.memory_space<vmem>>, vector<32x32xf32>
    %cst_10 = arith.constant dense<0.000000e+00> : vector<8x32xf32>
    %10 = tpu.matmul %8, %9, %cst_10 {dimension_numbers = #tpu.dot_dimension_numbers<[1], [0], [0], [1], [0, 0, 1, 1], [], []>} : vector<8x32xf32>, vector<32x32xf32>, vector<8x32xf32> -> vector<8x32xf32>
    %c0_11 = arith.constant 0 : index
    %c0_12 = arith.constant 0 : index
    %11 = vector.load %arg10[%c0_11, %c0_12] : memref<8x32xf32, #tpu.memory_space<vmem>>, vector<8x32xf32>
    %cst_13 = arith.constant dense<0.000000e+00> : vector<8x8xf32>
    %12 = tpu.matmul %11, %6, %cst_13 {dimension_numbers = #tpu.dot_dimension_numbers<[1], [1], [0], [0], [0, 0, 1, 0], [], []>} : vector<8x32xf32>, vector<8x32xf32>, vector<8x8xf32> -> vector<8x8xf32>
    %c0_14 = arith.constant 0 : index
    %c0_15 = arith.constant 0 : index
    %13 = vector.load %arg11[%c0_14, %c0_15] : memref<8x1xf32, #tpu.memory_space<vmem>>, vector<8x1xf32>
    %cst_16 = arith.constant dense<0xFF800000> : vector<8xf32>
    %14 = vector.multi_reduction <maximumf>, %12, %cst_16 [1] : vector<8x8xf32> to vector<8xf32>
    %15 = vector.shape_cast %14 : vector<8xf32> to vector<8x1xf32>
    %16 = arith.maximumf %13, %15 : vector<8x1xf32>
    %17 = arith.subf %13, %16 : vector<8x1xf32>
    %18 = math.exp %17 : vector<8x1xf32>
    %19 = vector.broadcast %16 : vector<8x1xf32> to vector<8x8xf32>
    %20 = arith.subf %12, %19 : vector<8x8xf32>
    %21 = math.exp %20 : vector<8x8xf32>
    %c0_17 = arith.constant 0 : index
    %c0_18 = arith.constant 0 : index
    %22 = vector.load %arg12[%c0_17, %c0_18] : memref<8x1xf32, #tpu.memory_space<vmem>>, vector<8x1xf32>
    %23 = arith.mulf %18, %22 : vector<8x1xf32>
    %cst_19 = arith.constant dense<0.000000e+00> : vector<8xf32>
    %24 = vector.multi_reduction <add>, %21, %cst_19 [1] : vector<8x8xf32> to vector<8xf32>
    %25 = vector.shape_cast %24 : vector<8xf32> to vector<8x1xf32>
    %26 = arith.addf %23, %25 : vector<8x1xf32>
    %c0_20 = arith.constant 0 : index
    %c0_21 = arith.constant 0 : index
    %27 = vector.load %arg12[%c0_20, %c0_21] : memref<8x1xf32, #tpu.memory_space<vmem>>, vector<8x1xf32>
    tpu.vector_store %arg12[%c0_20, %c0_21], %26 {strides = array<i32>} : memref<8x1xf32, #tpu.memory_space<vmem>>, vector<8x1xf32>,
    %c0_22 = arith.constant 0 : index
    %c0_23 = arith.constant 0 : index
    %28 = vector.load %arg13[%c0_22, %c0_23] : memref<8x32xf32, #tpu.memory_space<vmem>>, vector<8x32xf32>
    %29 = vector.broadcast %18 : vector<8x1xf32> to vector<8x32xf32>
    %30 = arith.mulf %29, %28 : vector<8x32xf32>
    %cst_24 = arith.constant dense<0.000000e+00> : vector<8x32xf32>
    %31 = tpu.matmul %21, %10, %cst_24 {dimension_numbers = #tpu.dot_dimension_numbers<[1], [0], [0], [1], [0, 0, 1, 1], [], []>} : vector<8x8xf32>, vector<8x32xf32>, vector<8x32xf32> -> vector<8x32xf32>
    %32 = arith.addf %30, %31 : vector<8x32xf32>
    %c0_25 = arith.constant 0 : index
    %c0_26 = arith.constant 0 : index
    %33 = vector.load %arg13[%c0_25, %c0_26] : memref<8x32xf32, #tpu.memory_space<vmem>>, vector<8x32xf32>
    tpu.vector_store %arg13[%c0_25, %c0_26], %32 {strides = array<i32>} : memref<8x32xf32, #tpu.memory_space<vmem>>, vector<8x32xf32>,
    %c0_27 = arith.constant 0 : index
    %c0_28 = arith.constant 0 : index
    %34 = vector.load %arg11[%c0_27, %c0_28] : memref<8x1xf32, #tpu.memory_space<vmem>>, vector<8x1xf32>
    tpu.vector_store %arg11[%c0_27, %c0_28], %16 {strides = array<i32>} : memref<8x1xf32, #tpu.memory_space<vmem>>, vector<8x1xf32>,
    %c0_i32_29 = arith.constant 0 : i32
    %35 = arith.cmpi eq, %arg2, %c0_i32_29 : i32
    %36 = arith.extui %35 : i1 to i32
    %c0_i32_30 = arith.constant 0 : i32
    %37 = arith.cmpi ne, %36, %c0_i32_30 : i32
    scf.if %37 {
      %c0_31 = arith.constant 0 : index
      %c0_32 = arith.constant 0 : index
      %38 = vector.load %arg12[%c0_31, %c0_32] : memref<8x1xf32, #tpu.memory_space<vmem>>, vector<8x1xf32>
      %39 = tpu.reciprocal %38 {approx = true} : vector<8x1xf32> -> vector<8x1xf32>
      %40 = arith.mulf %38, %39 : vector<8x1xf32>
      %cst_33 = arith.constant 2.000000e+00 : f32
      %41 = vector.broadcast %cst_33 : f32 to vector<8x1xf32>
      %42 = arith.subf %41, %40 : vector<8x1xf32>
      %43 = arith.mulf %39, %42 : vector<8x1xf32>
      %c0_34 = arith.constant 0 : index
      %c0_35 = arith.constant 0 : index
      %44 = vector.load %arg13[%c0_34, %c0_35] : memref<8x32xf32, #tpu.memory_space<vmem>>, vector<8x32xf32>
      %45 = vector.broadcast %43 : vector<8x1xf32> to vector<8x32xf32>
      %46 = arith.mulf %44, %45 : vector<8x32xf32>
      %c0_36 = arith.constant 0 : index
      %c0_37 = arith.constant 0 : index
      %c0_38 = arith.constant 0 : index
      %47 = vector.load %arg9[%c0_36, %c0_37, %c0_38] : memref<1x8x32xf32, #tpu.memory_space<vmem>>, vector<1x8x32xf32>
      %48 = vector.shape_cast %47 : vector<1x8x32xf32> to vector<8x32xf32>
      %49 = vector.shape_cast %46 : vector<8x32xf32> to vector<1x8x32xf32>
      tpu.vector_store %arg9[%c0_36, %c0_37, %c0_38], %49 {strides = array<i32>} : memref<1x8x32xf32, #tpu.memory_space<vmem>>, vector<1x8x32xf32>,
    } else {
    }
    return
  }
  func.func @transform_0(%arg0: i32, %arg1: i32, %arg2: i32) -> (i32, i32, i32) {
    %c0_i32 = arith.constant 0 : i32
    %c0_i32_0 = arith.constant 0 : i32
    return %arg0, %arg1, %c0_i32 : i32, i32, i32
  }
  func.func @transform_1(%arg0: i32, %arg1: i32, %arg2: i32) -> (i32, i32, i32) {
    %c0_i32 = arith.constant 0 : i32
    %c0_i32_0 = arith.constant 0 : i32
    return %arg0, %arg2, %c0_i32 : i32, i32, i32
  }
  func.func @transform_2(%arg0: i32, %arg1: i32, %arg2: i32) -> (i32, i32, i32) {
    %c0_i32 = arith.constant 0 : i32
    %c0_i32_0 = arith.constant 0 : i32
    return %arg0, %arg2, %c0_i32 : i32, i32, i32
  }
  func.func @transform_3(%arg0: i32, %arg1: i32, %arg2: i32) -> (i32, i32) {
    %c0_i32 = arith.constant 0 : i32
    %c0_i32_0 = arith.constant 0 : i32
    %c0_i32_1 = arith.constant 0 : i32
    return %c0_i32, %c0_i32_0 : i32, i32
  }
  func.func @transform_4(%arg0: i32, %arg1: i32, %arg2: i32) -> (i32, i32) {
    %c0_i32 = arith.constant 0 : i32
    %c0_i32_0 = arith.constant 0 : i32
    %c0_i32_1 = arith.constant 0 : i32
    return %c0_i32, %c0_i32_0 : i32, i32
  }
  func.func @transform_5(%arg0: i32, %arg1: i32, %arg2: i32) -> (i32, i32) {
    %c0_i32 = arith.constant 0 : i32
    %c0_i32_0 = arith.constant 0 : i32
    %c0_i32_1 = arith.constant 0 : i32
    return %c0_i32, %c0_i32_0 : i32, i32
  }
  func.func @transform_6(%arg0: i32, %arg1: i32, %arg2: i32) -> (i32, i32, i32) {
    %c0_i32 = arith.constant 0 : i32
    %c0_i32_0 = arith.constant 0 : i32
    return %arg0, %arg1, %c0_i32 : i32, i32, i32
  }
}

</mosaic_0001>

<bundles_post_ra>
// kernel: tpu_custom_call.1
= control target key start
LH: loop header
LB: loop body
LE: loop exit
PB: predicated region body
PF: predicated region fallthrough
CT: control target
= control target key end

     0   :  { %s1498_s0 = inlined_call_operand.hbm [shape: f32[2,8,32], index: 0, kind: input, shape index: {}]   ;;  %s1499_s1 = inlined_call_operand.hbm [shape: f32[2,8,32], index: 1, kind: input, shape index: {}]   ;;  %s1500_s2 = inlined_call_operand.hbm [shape: f32[2,8,32], index: 2, kind: input, shape index: {}]   ;;  %s1501_s3 = inlined_call_operand.hbm [shape: f32[32,32], index: 3, kind: input, shape index: {}]   ;;  %s1502_s4 = inlined_call_operand.hbm [shape: f32[32,32], index: 4, kind: input, shape index: {}]   ;;  %s1503_s5 = inlined_call_operand.hbm [shape: f32[32,32], index: 5, kind: input, shape index: {}]   ;;  %s1504_s6 = inlined_call_operand.hbm [shape: f32[2,8,32], index: 6, kind: output, shape index: {}]  }
   0x1   :  { %1516 = sst [smem:[#allocation29_spill]] %s1499_s1 }
   0x2   :  { %1517 = sst [smem:[#allocation30_spill]] %s1501_s3 }
   0x3   :  { %1518 = sst [smem:[#allocation31_spill]] %s1502_s4 }
   0x4   :  { %1519 = sst [smem:[#allocation32_spill]] %s1503_s5 }
   0x5   :  { %11 = vsyncpa [#allocation7], 0 }
   0x6   :  { %13 = vsyncpa [#allocation7 + $0x1], 0 }
   0x7   :  { %14 = vsyncpa [#allocation10], 0 }
   0x8   :  { %16 = vsyncpa [#allocation10 + $0x1], 0 }
   0x9   :  { %17 = vsyncpa [#allocation13], 0 }
   0xa   :  { %18 = vsyncpa [#allocation16], 0 }
   0xb   :  { %19 = vsyncpa [#allocation8], 0 }
   0xc   :  { %21 = vsyncpa [#allocation8 + $0x1], 0  ;;  %s1262_s21 = smov 0   ;;  %s1264_s22 = smov 0  }
   0xd   :  { %s1266_s23 = smov 0   ;;  %s1268_s24 = smov 0  }
   0xe   :  { %s1270_s25 = smov 0   ;;  %s1272_s26 = smov 0  }
   0xf LB: > { %1520 = sst [smem:[#allocation23_spill]] %s1197_s21  ;;  %s1293_s27 = sadd.s32 4294967295, %s1217_s26   ;;  %s1217_s26 = sphi %s1272_s26, %s27_s26   ;;  %s1213_s25 = sphi %s1270_s25, %s1545_s25   ;;  %s1209_s24 = sphi %s1268_s24, %s1544_s24   ;;  %s1205_s23 = sphi %s1266_s23, %s1548_s23   ;;  %s1201_s22 = sphi %s1264_s22, %s1547_s22   ;;  %s1197_s21 = sphi %s1262_s21, %s1546_s21  }
  0x10   : > { %1521 = sst [smem:[#allocation24_spill]] %s1213_s25  ;;  %p797_p0 = scmp.ge.s32.totalorder %s1217_s26, 1 }
  0x11   : > { %1522 = sst [smem:[#allocation25_spill]] %s1217_s26  ;;  %p69_p1 = scmp.eq.s32.totalorder %s1293_s27, 0 }
  0x12   : > { %p226_p2 = scmp.lt.s32.totalorder %s1217_s26, 3  ;;  %s1523_s3 = sld [smem:[#allocation30_spill]] }
  0x13   : > { %s1219_s8 = smov [#allocation12]   ;;  %p801_p6 = scmp.ge.s32.totalorder %s1217_s26, 2 }
  0x14   : > { %p1301_p3 = pnand %p797_p0, %p226_p2  ;;  %s239_s9 = sshll.u32 %s1219_s8, 4  ;;  %s240_s9 = int_to_ptr.vmem [resolvable:$true] %s239_s9 }
  0x15   : > { %s1505_s11 = smov 128   ;;  %s1507_s12 = smov 8  }
  0x16   : > { %p846_p4 = pneg %p1301_p3  ;;  %s796_s13 = sadd.s32 4294967294, %s1217_s26  }
  0x17   : > { %s46_s14 = sadd.s32 1, %s1213_s25  ;;  %s55_s15 = sadd.s32 1, %s1205_s23 }
  0x18   : > { %s237_s30 = sshll.u32 %s1523_s3, 4  ;;  %p1309_p5 = pnand %p846_p4, %p69_p1  ;;  %s238_s30 = int_to_ptr.hbm [resolvable:$true] %s237_s30 }
  0x19   : > { %p48_p7 = scmp.ge.s32.totalorder %s46_s14, 2  ;;  %p62_p8 = scmp.ne.s32.totalorder %s1205_s23, %s1201_s22 }
  0x1a   : > { %849 = dma.hbm_to_vmem [thread:$0]  (!%p1309_p5), %s238_s30, 512, %s240_s9, [#allocation13], %s1505_s11, %s1505_s11, %s1507_s12  }
  0x1b   : > { %p63_p9 = scmp.eq.s32.totalorder %s1217_s26, 0  ;;  %p68_p10 = scmp.ne.s32.totalorder %s1201_s22, %s1197_s21 }
  0x1c   : > { %s1550_s14 = smov (%p48_p7, %s46_s14), 0  ;;  %p213_p13 = scmp.eq.s32.totalorder %s1293_s27, 1 }
  0x1d   : > { %1526 = sst [smem:[#allocation26_spill]] %s1550_s14  ;;  %p1329_p11 = por %p63_p9, %p62_p8 }
  0x1e   : > { %p1335_p12 = por %p69_p1, %p68_p10  ;;  %s50_s18 = ssub.s32 %s1213_s25, %s1550_s14 }
  0x1f   : > { %p53_p0 = scmp.eq.s32.totalorder %s50_s18, 0  ;;  %p219_p2 = scmp.eq.s32.totalorder %s796_s13, 1 }
  0x20   : > { %p1342_p4 = por %p213_p13, %p62_p8  ;;  %p873_p7 = scmp.lt.s32.totalorder %s1217_s26, 2 }
  0x21   : > { %s1348_s20 = scalar_select %p53_p0, %s1205_s23, %s55_s15  }
  0x22   : > { %p1350_p9 = por %p219_p2, %p68_p10  ;;  %s1509_s29 = sand.u32 1, %s1205_s23  }
  0x23   : > { %1530 = sst [smem:[#allocation27_spill]] %s1348_s20  ;;  %s1357_s30 = sshll.u32 %s1509_s29, 3 }
  0x24   : > { %s1531_s28 = scalar_select %p1350_p9, 1, 0 }
  0x25   : > { %s1360_s8 = sshll.u32 %s1213_s25, 3  ;;  %p1364_p8 = pnand %p873_p7, %p1329_p11 }
  0x26   : > { %1532 = sst [smem:[#allocation28_spill]] %s1531_s28  ;;  %s301_s13 = sand.u32 1, %s1217_s26  }
  0x27   : > { %s1534_s1 = sld [smem:[#allocation29_spill]]  ;;  %s305_s3 = scalar_lea.vmem [#allocation9], %s1357_s30 }
  0x28   : > { %s314_s29 = sshll.u32 %s305_s3, 4  ;;  %s1374_s16 = scalar_lea.sflag [#allocation10], %s301_s13  ;;  %s315_s29 = int_to_ptr.vmem [resolvable:$true] %s314_s29 }
  0x29   : > { %s1535_s4 = sld [smem:[#allocation31_spill]]  ;;  %s1222_s15 = smov [#allocation14]  }
  0x2a   : > { %s1536_s5 = sld [smem:[#allocation32_spill]]  ;;  %s1537_s13 = smov 8  }
  0x2b   : > { %s1538_s26 = smov 128   ;;  %s1223_s25 = smov [#allocation15]  }
  0x2c   : > { %s285_s3 = scalar_lea.vmem [#allocation6], %s1357_s30  ;;  %s325_s28 = scalar_lea.vmem [#allocation11], %s1357_s30 }
  0x2d   : > { %s310_s11 = scalar_lea.hbm %s1534_s1, %s1360_s8  ;;  %s294_s18 = sshll.u32 %s285_s3, 4  ;;  %s295_s18 = int_to_ptr.vmem [resolvable:$true] %s294_s18 }
  0x2e   : > { %s312_s12 = sshll.u32 %s310_s11, 4  ;;  %s253_s11 = sshll.u32 %s1222_s15, 4  ;;  %s313_s12 = int_to_ptr.hbm [resolvable:$true] %s312_s12  ;;  %s254_s11 = int_to_ptr.vmem [resolvable:$true] %s253_s11 }
  0x2f   : > { %862 = dma.hbm_to_vmem [thread:$0]  (!%p1364_p8), %s313_s12, 128, %s315_s29, %s1374_s16  }
  0x30   : > { %s251_s20 = sshll.u32 %s1535_s4, 4  ;;  %s265_s1 = sshll.u32 %s1536_s5, 4  ;;  %s252_s20 = int_to_ptr.hbm [resolvable:$true] %s251_s20  ;;  %s266_s1 = int_to_ptr.hbm [resolvable:$true] %s265_s1 }
  0x31   : > { %852 = dma.hbm_to_vmem [thread:$0]  (!%p1309_p5), %s252_s20, 512, %s254_s11, [#allocation13], %s1538_s26, %s1538_s26, %s1537_s13  }
  0x32   : > { %s267_s12 = sshll.u32 %s1223_s25, 4  ;;  %s290_s15 = scalar_lea.hbm %s1498_s0, %s1360_s8  ;;  %s268_s12 = int_to_ptr.vmem [resolvable:$true] %s267_s12 }
  0x33   : > { %855 = dma.hbm_to_vmem [thread:$0]  (!%p1309_p5), %s266_s1, 512, %s268_s12, [#allocation16], %s1538_s26, %s1538_s26, %s1537_s13  }
  0x34   : > { %s292_s4 = sshll.u32 %s290_s15, 4  ;;  %s1539_s20 = sand.u32 1, %s1205_s23   ;;  %s293_s4 = int_to_ptr.hbm [resolvable:$true] %s292_s4 }
  0x35   : > { %s282_s11 = scalar_lea.sflag [#allocation7], %s1539_s20  ;;  %s330_s5 = scalar_lea.hbm %s1500_s2, %s1360_s8 }
  0x36   : > { %859 = dma.hbm_to_vmem [thread:$0]  (!%p1364_p8), %s293_s4, 128, %s295_s18, %s282_s11  }
  0x37   : > { %s334_s21 = sshll.u32 %s325_s28, 4  ;;  %s332_s1 = sshll.u32 %s330_s5, 4  ;;  %s335_s21 = int_to_ptr.vmem [resolvable:$true] %s334_s21  ;;  %s333_s1 = int_to_ptr.hbm [resolvable:$true] %s332_s1 }
  0x38   : > { %865 = dma.hbm_to_vmem [thread:$0]  (!%p1364_p8), %s333_s1, 128, %s335_s21, %s1374_s16  }
  0x39   : > { %343 = sbr.rel (%p1301_p3) target bundleno = 827 (0x33b), region = 44  ;;  %s1415_s26 = sand.u32 (!%p1301_p3), 1, %s1201_s22  }
  0x3a   : > { %s1418_s4 = sshll.u32 (!%p1301_p3), %s1415_s26, 3  ;;  %s346_s8 = scalar_lea.sflag (!%p1301_p3), [#allocation7], %s1415_s26 }
  0x3b   : > { %s349_s30 = scalar_lea.vmem (!%p1301_p3), [#allocation6], %s1418_s4 }
  0x3e   : > { %1176 = dma.done.wait (%p1335_p12), %s346_s8, 128  }
  0x3f   : > { %1178 = vsyncadd (%p1335_p12), %s346_s8, 4294967168  ;;  %s355_s5 = sand.u32 1, %s1293_s27   ;;  %s359_s7 = scalar_lea.vmem [#allocation9], %s1418_s4 }
  0x40   : > { %s356_s21 = scalar_lea.sflag [#allocation10], %s355_s5 }
  0x41   : > { %1180 = dma.done.wait (%p1335_p12), %s356_s21, 256  }
  0x42   : > { %1182 = vsyncadd (%p1335_p12), %s356_s21, 4294967040  ;;  %s369_s28 = scalar_lea.vmem [#allocation11], %s1418_s4 }
  0x43   : > { %1184 = dma.done.wait (%p69_p1), [#allocation13], 1024  }
  0x44   : > { %1186 = vsyncadd (%p69_p1), [#allocation13], 4294966272 }
  0x45   : > { %1188 = dma.done.wait (%p69_p1), [#allocation16], 512  }
  0x46   : > { %1190 = vsyncadd (%p69_p1), [#allocation16], 4294966784  ;;  %v432_v0 = vld [vmem:[#allocation12 + $0x18] sm:$0xff]  ;;  %v431_v1 = vld [vmem:[#allocation12 + $0x10] sm:$0xff]  ;;  %vm433_vm0 = vcmask 261120   ;;  %vm459_vm1 = vcmask 7168  }
  0x47   : > { %449 = vmatpush.msra.mxu0 %v432_v0  ;;  %v467_v2 = vld [vmem:[#allocation14 + $0x18] sm:$0xff]  ;;  %v430_v3 = vld [vmem:[#allocation12 + $0x8] sm:$0xff]  ;;  %v466_v4 = vld [vmem:[#allocation14 + $0x10] sm:$0xff]  ;;  %v1224_v16 = vmov -inf   ;;  %vm548_vm2 = vcmask 64512   ;;  %v1225_v22 = vmov 0  }
  0x48   : > { %484 = vmatpush.msra.mxu1 %v467_v2  ;;  %v465_v5 = vld [vmem:[#allocation14 + $0x8] sm:$0xff]  ;;  %v429_v6 = vld [vmem:[#allocation12] sm:$0xff]  ;;  %v428_v7 = vld [vmem:[%s349_s30] sm:$0xff]  ;;  %460 = vst.msk [vmem:[#allocation3] sm:$0xff] %vm459_vm1, %v1224_v16  ;;  %934 = vset.pattern.permute.xlu0 %v1225_v22  ;;  %v1226_v23 = vmov 0.0   ;;  %s823_s27 = sshll.u32 %s1209_s24, 3 }
  0x49   : > { %450 = vmatpush.msra.mxu0 %v431_v1  ;;  %v464_v8 = vld [vmem:[#allocation14] sm:$0xff]  ;;  %v496_v14 = vld [vmem:[#allocation15 + $0x18] sm:$0xff]  ;;  %v495_v15 = vld [vmem:[#allocation15 + $0x10] sm:$0xff]  ;;  %935 = vset.pattern.permute.xlu1 %v1225_v22  ;;  %461 = vst.msk [vmem:[#allocation4] sm:$0xff] %vm459_vm1, %v1226_v23  ;;  %s633_s16 = scalar_lea.hbm %s1504_s6, %s823_s27  ;;  %s423_s13 = scalar_lea.vmem [#allocation17], %s1418_s4 }
  0x4a   : > { %485 = vmatpush.msra.mxu1 %v466_v4  ;;  %v463_v9 = vld [vmem:[%s359_s7] sm:$0xff]  ;;  %512 = vmatpush.msra.mxu2 %v496_v14  ;;  %v492_v19 = vld [vmem:[%s369_s28] sm:$0xff]  ;;  %462 = vst.msk [vmem:[#allocation5] sm:$0xff] %vm433_vm0, %v1226_v23  ;;  %s635_s12 = sshll.u32 %s423_s13, 4  ;;  %s637_s14 = sshll.u32 %s633_s16, 4  ;;  %s636_s12 = int_to_ptr.vmem [resolvable:$true] %s635_s12  ;;  %s638_s14 = int_to_ptr.hbm [resolvable:$true] %s637_s14 }
  0x4b   : > { %451 = vmatpush.msra.mxu0 %v430_v3  ;;  %v494_v17 = vld [vmem:[#allocation15 + $0x8] sm:$0xff]  ;;  %v493_v18 = vld [vmem:[#allocation15] sm:$0xff]  ;;  %936 = vset.pattern.permute.xlu2 %v1225_v22  ;;  %s622_s29 = scalar_lea.sflag [#allocation8], %s1415_s26  ;;  %s1137_s15 = sshra.s32 %s638_s14, 4  ;;  %s1138_s15 = int_to_ptr.hbm [resolvable:$true] %s1137_s15 }
  0x4c   : > { %486 = vmatpush.msra.mxu1 %v465_v5  ;;  %513 = vmatpush.msra.mxu2 %v495_v15  ;;  %s1139_s3 = scalar_lea.hbm %s1138_s15, 8  ;;  %s1143_s20 = scalar_lea.hbm %s1504_s6, 16 }
  0x4d   : > { %452 = vmatpush.msra.mxu0 %v429_v6  ;;  %p1140_p1 = scmp.ne.s32.totalorder %s1138_s15, %s1139_s3  ;;  %p1144_p10 = scmp.lt.s32.totalorder %s1138_s15, %s1504_s6 }
  0x4e   : > { %816 = vmatmul.msk.f32.vlgmr.msra.gmra.mxu0 %vm433_vm0, %v428_v7  ;;  %487 = vmatpush.msra.mxu1 %v464_v8  ;;  %p1145_p11 = scmp.lt.s32.totalorder %s1143_s20, %s1139_s3 }
  0x4f   : > { %817 = vmatmul.msk.f32.vlgmr.msra.gmra.mxu1 %vm433_vm0, %v463_v9  ;;  %514 = vmatpush.msra.mxu2 %v494_v17  ;;  %v547_v24 = vld [vmem:[#allocation3] sm:$0xff]  ;;  %p1141_p3 = pnand %p1140_p1, %p1342_p4 }
  0x50   : > { %v564_v36 = vld [vmem:[#allocation4] sm:$0xff]  ;;  %p1146_p12 = por %p1145_p11, %p1144_p10 }
  0x51   : > { %515 = vmatpush.msra.mxu2 %v493_v18  ;;  %v572_v44 = vld [vmem:[#allocation5] sm:$0xff]  ;;  %p1142_p5 = pneg %p1141_p3 }
  0x52   : > { %818 = vmatmul.msk.f32.vlgmr.msra.gmra.mxu2 %vm433_vm0, %v492_v19 }
  0x53   : > { %p1147_p13 = pnand %p1146_p12, %p1142_p5 }
  0xcb   : > { %v454_v10 = vpop.f32.mrf.mxu0 }
  0xcc   : > { %v457_v11 = vmul.f32 0.17677669, %v454_v10  ;;  %v489_v12 = vpop.f32.mrf.mxu1 }
  0xcd   : > { %819 = vmatpush.xpose.msk.msra.mxu3 %vm433_vm0, %v489_v12 }
  0xce   : > { %458 = vst.msk [vmem:[#allocation2] sm:$0xff] %vm433_vm0, %v457_v11 }
  0xd5   : > { %v520_v13 = vld [vmem:[#allocation2] sm:$0xff]  ;;  %v517_v28 = vpop.f32.mrf.mxu2 }
  0xd6   : > { %820 = vmatmul.msk.f32.vlgmr.msra.gmra.mxu3 %vm433_vm0, %v520_v13 }
  0xd7   : > { %597 = vmatpush.msrb.mxu3 %v517_v28 }
 0x159   : > { %v544_v20 = vpop.f32.mrf.mxu3 }
 0x15a   : > { %v549_v21 = vsel %vm548_vm2, %v544_v20, -inf }
 0x15b   : > { %550 = vmax.xlane.f32.xlu0 %v549_v21 }
 0x1ce   : > { %v551_v25 = vpop.xlane.xlu0 %550 }
 0x1cf   : > { %v552_v26 = vmax.f32 %v547_v24, %v551_v25 }
 0x1d1   : > { %v553_v27 = vsub.f32 %v547_v24, %v552_v26  ;;  %604 = vst.msk [vmem:[#allocation3] sm:$0xff] %vm459_vm1, %v552_v26  ;;  %558 = vperm.xlu0 %934, %v552_v26  }
 0x1d3   : > { %v554_v34 = vmul.f32 1.442695, %v553_v27 }
 0x243   : > { %v559_v29 = vpop.permute.xlu0 %558 }
 0x244   : > { %v561_v30 = vsub.f32 %v544_v20, %v559_v29 }
 0x246   : > { %v562_v31 = vmul.f32 1.442695, %v561_v30 }
 0x248   : > { %937 = vpow2.f32 %v562_v31 }
 0x249   : > { %939 = vpow2.f32 %v554_v34 }
 0x24e   : > { %v938_v32 = vpop.eup %937 }
 0x24f   : > { %821 = vmatmul.msk.f32.vlgmr.msrb.gmra.mxu3 %vm548_vm2, %v938_v32  ;;  %v566_v33 = vsel %vm548_vm2, %v938_v32, 0.0  ;;  %v940_v35 = vpop.eup %939 }
 0x250   : > { %567 = vadd.xlane.f32.xlu1 %v566_v33  ;;  %v565_v37 = vmul.f32 %v940_v35, %v564_v36 }
 0x269   : > { %575 = vperm.xlu1 %935, %v940_v35  }
 0x2c3   : > { %v568_v38 = vpop.xlane.xlu1 %567 }
 0x2c4   : > { %v569_v39 = vadd.f32 %v568_v38, %v565_v37 }
 0x2c6   : > { %571 = vst.msk [vmem:[#allocation4] sm:$0xff] %vm459_vm1, %v569_v39 }
 0x2cd   : > { %v608_v40 = vld [vmem:[#allocation4] sm:$0xff] }
 0x2ce   : > { %941 = vrcp.f32 %v608_v40 }
 0x2d2   : > { %v599_v48 = vpop.f32.mrf.mxu3 }
 0x2d4   : > { %v942_v41 = vpop.eup %941 }
 0x2d5   : > { %v610_v42 = vmul.f32 %v942_v41, %v608_v40 }
 0x2d7   : > { %v611_v43 = vsub.f32 2.0, %v610_v42 }
 0x2d9   : > { %v612_v45 = vmul.f32 %v942_v41, %v611_v43 }
 0x2db   : > { %v576_v46 = vpop.permute.xlu1 %575  ;;  %616 = vperm.xlu2 %936, %v612_v45  }
 0x2dc   : > { %v578_v47 = vmul.f32 %v576_v46, %v572_v44 }
 0x2de   : > { %v602_v49 = vadd.f32 %v599_v48, %v578_v47 }
 0x2e0   : > { %603 = vst.msk [vmem:[#allocation5] sm:$0xff] %vm433_vm0, %v602_v49 }
 0x2e7   : > { %v613_v50 = vld [vmem:[#allocation5] sm:$0xff] }
 0x335   : > { %v617_v51 = vpop.permute.xlu2 %616 }
 0x336   : > { %v619_v52 = vmul.f32 %v617_v51, %v613_v50 }
 0x338   : > { %620 = vst.msk [vmem:[%s423_s13] sm:$0xff] %vm433_vm0, %v619_v52 }
 0x339   : > { %1150 = shalt.err (!%p1147_p13)
}
 0x33a   : > { %844 = dma.vmem_to_hbm [thread:$0]  (%p1342_p4), %s636_s12, 128, %s638_s14, %s622_s29  }
 0x33b PF: > { %s1540_s25 = sld [smem:[#allocation23_spill]]  ;;  %p867_p0 = pnand %p801_p6, %p1350_p9 }
 0x33c   : > { %s1542_s26 = sld [smem:[#allocation25_spill]] }
 0x33d   : > { %p868_p2 = pneg %p867_p0 }
 0x341   : > { %s649_s4 = sand.u32 1, %s1540_s25  }
 0x342   : > { %s650_s8 = scalar_lea.sflag [#allocation8], %s649_s4 }
 0x343   : > { %1192 = dma.done.wait (%p868_p2), %s650_s8, 128  }
 0x344   : > { %1194 = vsyncadd (%p868_p2), %s650_s8, 4294967168  ;;  %s27_s26 = sadd.s32 1, %s1542_s26   ;;  %s1543_s30 = sld [smem:[#allocation27_spill]] }
 0x345   : > { %p24_p7 = scmp.ge.s32.totalorder %s27_s26, 4   ;;  %s1544_s24 = sld [smem:[#allocation24_spill]] }
 0x346   : > { %s1545_s25 = sld [smem:[#allocation26_spill]]  ;;  %s1546_s21 = smov %s1201_s22 }
 0x347   : > { %s1547_s22 = smov %s1205_s23  ;;  %26 = sbr.rel (!%p24_p7) target bundleno = 15 (0xf), region = 133 }
 0x34a   : > { %s1548_s23 = smov %s1543_s30 }
 0x34c   :  { %656 = vsyncpa [#allocation7], 1 }
 0x34d   :  { %658 = vsyncpa [#allocation7 + $0x1], 1 }
 0x34e   :  { %659 = vsyncpa [#allocation10], 1 }
 0x34f   :  { %661 = vsyncpa [#allocation10 + $0x1], 1 }
 0x350   :  { %662 = vsyncpa [#allocation13], 1 }
 0x351   :  { %663 = vsyncpa [#allocation16], 1 }
 0x352   :  { %664 = vsyncpa [#allocation8], 1 }
 0x353   :  { %666 = vsyncpa [#allocation8 + $0x1], 1 }

</bundles_post_ra>
